<compile_context>
chip_gen: v6e
topology: v6e:2x2x1
jax: 0.10.0
libtpu: 0.0.40
codegen_flags: <defaults>
</compile_context>

<pallas_src>
import math
import functools

import jax
import jax.numpy as jnp
from jax.experimental import pallas as pl
from jax.experimental.pallas import tpu as pltpu


# ----------------------------------------------------------------------------
# Kernel: one (L_tile, batch-row) block of x * (exp(-t * |deltas| + 1e-16) + shift)
# ----------------------------------------------------------------------------
def _exp_mod_kernel(t_ref, x_ref, deltas_ref, o_ref, factor_ref, *,
                    shift, cache_across_batch):
    # t_ref:       (1, lt, Dt)  f32   (Dt = 1, or Dp when L positions are lane-packed)
    # x_ref/o_ref: (1, lt, Dp)  x dtype
    # deltas_ref:  (1, Dp)      f32   (resident across the whole grid)
    # factor_ref:  (lt, Dp)     f32 VMEM scratch, persists across the inner batch axis
    def _compute_factor():
        decay = jnp.exp(-t_ref[0] * jnp.abs(deltas_ref[...]) + 1e-16)   # (lt, Dp) f32
        factor_ref[...] = decay + shift

    if cache_across_batch:
        # decay depends only on (L, D): compute once per L tile (b == 0), reuse for all b.
        pl.when(pl.program_id(1) == 0)(_compute_factor)
        factor = factor_ref[...]
    else:
        # t is batched -> factor differs per batch row; compute locally (no scratch trip).
        factor = jnp.exp(-t_ref[0] * jnp.abs(deltas_ref[...]) + 1e-16) + shift

    o_ref[0] = (x_ref[0].astype(jnp.float32) * factor).astype(o_ref.dtype)


# ----------------------------------------------------------------------------
# Tiling helpers
# ----------------------------------------------------------------------------
def _vmem_capacity_bytes():
    try:
        return int(pltpu.get_tpu_info().vmem_capacity_bytes)
    except Exception:
        return 64 << 20            # conservative fallback (v7x per-core VMEM)


def _sublane_granule(dtype):
    # 8 rows for 4-byte types, 16 for bf16, 32 for 1-byte types.
    return max(8, 32 // jnp.dtype(dtype).itemsize)


def _pick_l_tile(Lp, row_bytes, gran, vmem_cap):
    """Byte-targeted L tile: ~4 MiB/block on 64 MiB-VMEM chips, ~8 MiB otherwise."""
    target = (4 << 20) if vmem_cap <= (64 << 20) else (8 << 20)
    lt = (target // max(row_bytes, 1)) // gran * gran
    lt = max(gran, min(Lp, lt))
    if lt >= Lp:
        return Lp
    # Prefer a tile that divides Lp (avoids a ragged, masked tail block).
    for cand in range(lt, gran - 1, -gran):
        if Lp % cand == 0:
            return cand
    return lt                      # ragged tail: Pallas masks the last block's writes


# ----------------------------------------------------------------------------
# Wrapper: ExponentialModulation.forward(t, x)
# ----------------------------------------------------------------------------
def exponential_modulation(t, x, deltas, *, shift=0.0, modulate=True,
                           donate_x=False, _l_tile=None):
    """x * (exp(-t * |deltas| + 1e-16) + shift), broadcasting like the PyTorch module."""
    if not modulate:
        return x

    B, L, D = x.shape
    t = jnp.asarray(t, jnp.float32).reshape(-1, L, 1)            # (Bt, L, 1), Bt in {1, B}
    Bt = t.shape[0]
    deltas_row = jnp.asarray(deltas, jnp.float32).reshape(1, D)  # (1, D)
    itemsize = jnp.dtype(x.dtype).itemsize

    # ---- lane-density repack: if D % 128 != 0, fold g consecutive L positions into lanes
    g = 1
    if D % 128 != 0:
        cand = math.lcm(D, 128) // D
        if L % cand == 0:
            g = cand
    Lp, Dp = L // g, D * g
    if g > 1:
        x_in = x.reshape(B, Lp, Dp)                              # pure row-major reshape
        deltas_in = jnp.tile(deltas_row, (1, g))                 # (1, Dp)
        t_in = jnp.repeat(t.reshape(Bt, Lp, g), D, axis=-1)      # (Bt, Lp, Dp)
        Dt = Dp
    else:
        x_in, deltas_in, t_in, Dt = x, deltas_row, t, 1

    # ---- byte-targeted tiling over the (packed) L axis
    gran = _sublane_granule(x.dtype)
    vmem_cap = _vmem_capacity_bytes()
    if _l_tile is not None:
        lt = min(int(_l_tile), Lp)
        if lt < Lp:
            lt = max(gran, (lt // gran) * gran)
    else:
        lt = _pick_l_tile(Lp, Dp * itemsize, gran, vmem_cap)
    n_l = pl.cdiv(Lp, lt)
    grid = (n_l, B)                                              # batch innermost (fastest)

    cache_across_batch = (Bt == 1)
    t_index = (lambda i, b: (0, i, 0)) if Bt == 1 else (lambda i, b: (b, i, 0))

    # ---- explicit scoped-VMEM budget sized to the chosen tiles
    block_bytes = lt * Dp * itemsize
    need = (4 * block_bytes            # x in + out, double-buffered
            + lt * Dp * 4              # factor scratch (f32)
            + 2 * lt * Dt * 4          # t, double-buffered
            + 2 * Dp * 4               # deltas
            + (2 << 20))               # headroom
    vmem_limit = int(min(max(need, 16 << 20), vmem_cap))

    cost = pl.CostEstimate(
        flops=4 * B * Lp * Dp,
        transcendentals=(Lp * Dp) if cache_across_batch else (B * Lp * Dp),
        bytes_accessed=2 * B * Lp * Dp * itemsize + t_in.size * 4 + Dp * 4,
    )

    y = pl.pallas_call(
        functools.partial(_exp_mod_kernel, shift=float(shift),
                          cache_across_batch=cache_across_batch),
        out_shape=jax.ShapeDtypeStruct((B, Lp, Dp), x.dtype),
        grid=grid,
        in_specs=[
            pl.BlockSpec((1, lt, Dt), t_index),                   # t: re-fetched only per L tile
            pl.BlockSpec((1, lt, Dp), lambda i, b: (b, i, 0)),    # x tile, lanes dense
            pl.BlockSpec((1, Dp), lambda i, b: (0, 0)),           # deltas, resident
        ],
        out_specs=pl.BlockSpec((1, lt, Dp), lambda i, b: (b, i, 0)),
        scratch_shapes=[pltpu.VMEM((lt, Dp), jnp.float32)],       # cached (decay + shift)
        compiler_params=pltpu.CompilerParams(
            dimension_semantics=(("parallel", "arbitrary") if cache_across_batch
                                 else ("parallel", "parallel")),
            vmem_limit_bytes=vmem_limit,
        ),
        cost_estimate=cost,
        input_output_aliases=({1: 0} if donate_x else {}),
    )(t_in, x_in, deltas_in)

    return y.reshape(B, L, D) if g > 1 else y


# ----------------------------------------------------------------------------
# Pure-JAX reference (mirrors the PyTorch forward) for validation
# ----------------------------------------------------------------------------
def exponential_modulation_ref(t, x, deltas, *, shift=0.0, modulate=True):
    if modulate:
        decay = jnp.exp(-t * jnp.abs(deltas) + 1e-16)
        x = x * (decay + shift)
    return x


def make_deltas(d_model, fast_decay_pct=0.3, slow_decay_pct=1.5, target=0.01):
    # Mirrors ExponentialModulation.__init__
    max_decay = math.log(target + 1e-16) / fast_decay_pct
    min_decay = math.log(target + 1e-16) / slow_decay_pct
    return jnp.linspace(min_decay, max_decay, d_model, dtype=jnp.float32)[None, None]


if __name__ == "__main__":
    key = jax.random.PRNGKey(0)
    k1, k2 = jax.random.split(key)

    # Case 1: Hyena-like usage with d_model=16 (< 128) -> exercises the lane-packing path.
    B, L, D = 2, 256, 16
    deltas = make_deltas(D)                                           # (1, 1, D)
    t = jnp.linspace(0.0, 1.0, L, dtype=jnp.float32)[None, :, None]   # (1, L, 1)
    x = jax.random.normal(k1, (B, L, D), jnp.float32)
    fwd = jax.jit(functools.partial(exponential_modulation, shift=0.0, modulate=True))
    y = jax.block_until_ready(fwd(t, x, deltas))
    y_ref = exponential_modulation_ref(t, x, deltas)
    if not jnp.allclose(y, y_ref, atol=1e-5, rtol=1e-5):
        raise AssertionError("Pallas ExponentialModulation mismatch (packed-lane path)")

    # Case 2: d_model multiple of 128, multiple L tiles -> exercises the cached-factor
    # batch loop (pl.when guard) and the lane-dense direct path.
    B2, L2, D2 = 2, 512, 128
    deltas2 = make_deltas(D2)
    t2 = jnp.linspace(0.0, 1.0, L2, dtype=jnp.float32)[None, :, None]
    x2 = jax.random.normal(k2, (B2, L2, D2), jnp.float32)
    fwd2 = jax.jit(functools.partial(exponential_modulation, shift=0.0, _l_tile=128))
    y2 = jax.block_until_ready(fwd2(t2, x2, deltas2))
    y2_ref = exponential_modulation_ref(t2, x2, deltas2)
    if not jnp.allclose(y2, y2_ref, atol=1e-5, rtol=1e-5):
        raise AssertionError("Pallas ExponentialModulation mismatch (tiled path)")

    print("KERNEL_OK")
</pallas_src>

<mosaic_0001>
module attributes {stable_mosaic.version = 11 : i64} {
  func.func @_exp_mod_kernel(%arg0: i32, %arg1: i32, %arg2: memref<1x32x128xf32, #tpu.memory_space<vmem>>, %arg3: memref<1x32x128xf32, #tpu.memory_space<vmem>>, %arg4: memref<1x128xf32, #tpu.memory_space<vmem>>, %arg5: memref<1x32x128xf32, #tpu.memory_space<vmem>>, %arg6: memref<32x128xf32, #tpu.memory_space<vmem>>) attributes {dimension_semantics = [#tpu.dimension_semantics<parallel>, #tpu.dimension_semantics<arbitrary>], iteration_bounds = array<i64: 1, 2>, scalar_prefetch = 0 : i64, scratch_operands = 1 : i64, tpu.core_type = #tpu.core_type<tc>, window_params = [{transform_indices = @transform_0, window_bounds = array<i64: 1, 32, 128>}, {transform_indices = @transform_1, window_bounds = array<i64: 1, 32, 128>}, {pipeline_mode = #tpu.pipeline_mode<synchronous>, transform_indices = @transform_2, window_bounds = array<i64: 1, 128>}, {transform_indices = @transform_3, window_bounds = array<i64: 1, 32, 128>}]} {
    %c0_i32 = arith.constant 0 : i32
    %0 = arith.cmpi eq, %arg1, %c0_i32 : i32
    %1 = arith.extui %0 : i1 to i32
    %c0_i32_0 = arith.constant 0 : i32
    %2 = arith.cmpi ne, %1, %c0_i32_0 : i32
    scf.if %2 {
      %c0_8 = arith.constant 0 : index
      %c0_9 = arith.constant 0 : index
      %c0_10 = arith.constant 0 : index
      %10 = vector.load %arg2[%c0_8, %c0_9, %c0_10] : memref<1x32x128xf32, #tpu.memory_space<vmem>>, vector<1x32x128xf32>
      %11 = vector.shape_cast %10 : vector<1x32x128xf32> to vector<32x128xf32>
      %cst = arith.constant 0.000000e+00 : f32
      %12 = vector.broadcast %cst : f32 to vector<32x128xf32>
      %13 = arith.subf %12, %11 : vector<32x128xf32>
      %c0_11 = arith.constant 0 : index
      %c0_12 = arith.constant 0 : index
      %14 = vector.load %arg4[%c0_11, %c0_12] : memref<1x128xf32, #tpu.memory_space<vmem>>, vector<1x128xf32>
      %15 = math.absf %14 : vector<1x128xf32>
      %16 = vector.broadcast %15 : vector<1x128xf32> to vector<32x128xf32>
      %17 = arith.mulf %13, %16 : vector<32x128xf32>
      %cst_13 = arith.constant 1.000000e-16 : f32
      %18 = vector.broadcast %cst_13 : f32 to vector<32x128xf32>
      %19 = arith.addf %17, %18 : vector<32x128xf32>
      %20 = math.exp %19 : vector<32x128xf32>
      %cst_14 = arith.constant 0.000000e+00 : f32
      %21 = vector.broadcast %cst_14 : f32 to vector<32x128xf32>
      %22 = arith.addf %20, %21 : vector<32x128xf32>
      %c0_15 = arith.constant 0 : index
      %c0_16 = arith.constant 0 : index
      %23 = vector.load %arg6[%c0_15, %c0_16] : memref<32x128xf32, #tpu.memory_space<vmem>>, vector<32x128xf32>
      tpu.vector_store %arg6[%c0_15, %c0_16], %22 {strides = array<i32>} : memref<32x128xf32, #tpu.memory_space<vmem>>, vector<32x128xf32>,
    } else {
    }
    %c0 = arith.constant 0 : index
    %c0_1 = arith.constant 0 : index
    %3 = vector.load %arg6[%c0, %c0_1] : memref<32x128xf32, #tpu.memory_space<vmem>>, vector<32x128xf32>
    %c0_2 = arith.constant 0 : index
    %c0_3 = arith.constant 0 : index
    %c0_4 = arith.constant 0 : index
    %4 = vector.load %arg3[%c0_2, %c0_3, %c0_4] : memref<1x32x128xf32, #tpu.memory_space<vmem>>, vector<1x32x128xf32>
    %5 = vector.shape_cast %4 : vector<1x32x128xf32> to vector<32x128xf32>
    %6 = arith.mulf %5, %3 : vector<32x128xf32>
    %c0_5 = arith.constant 0 : index
    %c0_6 = arith.constant 0 : index
    %c0_7 = arith.constant 0 : index
    %7 = vector.load %arg5[%c0_5, %c0_6, %c0_7] : memref<1x32x128xf32, #tpu.memory_space<vmem>>, vector<1x32x128xf32>
    %8 = vector.shape_cast %7 : vector<1x32x128xf32> to vector<32x128xf32>
    %9 = vector.shape_cast %6 : vector<32x128xf32> to vector<1x32x128xf32>
    tpu.vector_store %arg5[%c0_5, %c0_6, %c0_7], %9 {strides = array<i32>} : memref<1x32x128xf32, #tpu.memory_space<vmem>>, vector<1x32x128xf32>,
    return
  }
  func.func @transform_0(%arg0: i32, %arg1: i32) -> (i32, i32, i32) {
    %c0_i32 = arith.constant 0 : i32
    %c0_i32_0 = arith.constant 0 : i32
    %c0_i32_1 = arith.constant 0 : i32
    return %c0_i32, %arg0, %c0_i32_0 : i32, i32, i32
  }
  func.func @transform_1(%arg0: i32, %arg1: i32) -> (i32, i32, i32) {
    %c0_i32 = arith.constant 0 : i32
    %c0_i32_0 = arith.constant 0 : i32
    return %arg1, %arg0, %c0_i32 : i32, i32, i32
  }
  func.func @transform_2(%arg0: i32, %arg1: i32) -> (i32, i32) {
    %c0_i32 = arith.constant 0 : i32
    %c0_i32_0 = arith.constant 0 : i32
    %c0_i32_1 = arith.constant 0 : i32
    return %c0_i32, %c0_i32_0 : i32, i32
  }
  func.func @transform_3(%arg0: i32, %arg1: i32) -> (i32, i32, i32) {
    %c0_i32 = arith.constant 0 : i32
    %c0_i32_0 = arith.constant 0 : i32
    return %arg1, %arg0, %c0_i32 : i32, i32, i32
  }
}

</mosaic_0001>

<bundles_post_ra>
// kernel: exponential_modulation.1
= control target key start
LH: loop header
LB: loop body
LE: loop exit
PB: predicated region body
PF: predicated region fallthrough
CT: control target
= control target key end

     0   :  { %s485_s12 = smov 0   ;;  %s487_s13 = smov 0   ;;  %s545_s0 = inlined_call_operand.vmem [shape: f32[1,32,128], index: 0, kind: input, shape index: {}]   ;;  %s546_s1 = inlined_call_operand.vmem [shape: f32[2,32,128], index: 1, kind: input, shape index: {}]   ;;  %s547_s2 = inlined_call_operand.vmem [shape: f32[1,128], index: 2, kind: input, shape index: {}]   ;;  %s548_s3 = inlined_call_operand.vmem [shape: f32[2,32,128], index: 3, kind: output, shape index: {}]  }
   0x1   :  { %s489_s14 = smov 0  }
   0x2 LB: > { %s22_s15 = sadd.s32 1, %s459_s13  ;;  %p399_p0 = scmp.ge.s32.totalorder %s463_s14, 1  ;;  %s463_s14 = sphi %s489_s14, %s13_s14   ;;  %s459_s13 = sphi %s487_s13, %s550_s13   ;;  %s455_s12 = sphi %s485_s12, %s549_s12  }
   0x3   : > { %p23_p1 = scmp.ge.s32.totalorder %s22_s15, 2  ;;  %p169_p2 = scmp.lt.s32.totalorder %s463_s14, 3 }
   0x5   : > { %s552_s15 = smov (%p23_p1, %s22_s15), 0  ;;  %p170_p3 = pnand %p399_p0, %p169_p2 }
   0x6   : > { %p213_p4 = scmp.lt.s32.totalorder (!%p170_p3), %s455_s12, 1  ;;  %p404_p5 = scmp.ne.s32.totalorder (!%p170_p3), %s455_s12, 0 }
   0x7   : > { %173 = sbr.rel (%p170_p3) target bundleno = 60 (0x3c), region = 32 }
   0xc   : > { %s214_s16 = scalar_select %p213_p4, %s455_s12, 1 }
   0xd   : > { %235 = sbr.rel (%p404_p5) target bundleno = 50 (0x32), region = 36 }
   0xe   : > { %s407_s17 = sshll.u32 %s214_s16, 5 }
   0xf   : > { %s506_s20 = scalar_lea.vmem %s546_s1, %s407_s17  ;;  %s511_s23 = scalar_lea.vmem %s548_s3, %s407_s17 }
  0x12   : > { %v236_v0 = vld [vmem:[%s545_s0] sm:$0xff]  ;;  %v247_v2 = vlaneseq  ;;  %v237_v3 = vld [vmem:[%s545_s0 + $0x8] sm:$0xff]  ;;  %v238_v4 = vld [vmem:[%s545_s0 + $0x10] sm:$0xff] }
  0x13   : > { %v244_v1 = vld [vmem:[%s547_s2] sm:$0x1]  ;;  %v239_v5 = vld [vmem:[%s545_s0 + $0x18] sm:$0xff]  ;;  %v240_v8 = vsub.f32 0.0, %v236_v0  ;;  %v241_v10 = vsub.f32 0.0, %v237_v3  ;;  %v242_v11 = vsub.f32 0.0, %v238_v4 }
  0x14   : > { %v245_v6 = vand.u32 2147483647, %v244_v1  ;;  %v248_v7 = vshrl.u32 %v247_v2, 7  ;;  %v243_v12 = vsub.f32 0.0, %v239_v5 }
  0x16   : > { %v249_v9 = vsub.s32 0, %v248_v7 }
  0x18   : > { %v250_v13 = vrot.slane %v245_v6, %v249_v9 }
  0x1a   : > { %v252_v14 = vmul.f32 %v250_v13, %v240_v8  ;;  %v253_v15 = vmul.f32 %v250_v13, %v241_v10  ;;  %v254_v16 = vmul.f32 %v250_v13, %v242_v11  ;;  %v255_v17 = vmul.f32 %v250_v13, %v243_v12 }
  0x1c   : > { %v256_v18 = vadd.f32 1e-16, %v252_v14  ;;  %v257_v19 = vadd.f32 1e-16, %v253_v15  ;;  %v258_v20 = vadd.f32 1e-16, %v254_v16 }
  0x1d   : > { %v259_v21 = vadd.f32 1e-16, %v255_v17 }
  0x1e   : > { %v260_v22 = vmul.f32 1.442695, %v256_v18  ;;  %v262_v23 = vmul.f32 1.442695, %v257_v19  ;;  %v264_v24 = vmul.f32 1.442695, %v258_v20 }
  0x1f   : > { %v266_v25 = vmul.f32 1.442695, %v259_v21 }
  0x20   : > { %433 = vpow2.f32 %v260_v22 }
  0x21   : > { %435 = vpow2.f32 %v262_v23 }
  0x22   : > { %437 = vpow2.f32 %v264_v24 }
  0x23   : > { %439 = vpow2.f32 %v266_v25 }
  0x2d   : > { %v434_v26 = vpop.eup %433 }
  0x2e   : > { %v436_v27 = vpop.eup %435  ;;  %272 = vst [vmem:[#allocation2 + $0x10] sm:$0xff] %v434_v26 }
  0x2f   : > { %v438_v28 = vpop.eup %437  ;;  %273 = vst [vmem:[#allocation2] sm:$0xff] %v436_v27 }
  0x30   : > { %v440_v29 = vpop.eup %439  ;;  %274 = vst [vmem:[#allocation2 + $0x18] sm:$0xff] %v438_v28 }
  0x31   : > { %275 = vst [vmem:[#allocation2 + $0x8] sm:$0xff] %v440_v29 }
  0x32 PF: > { %v280_v31 = vld [vmem:[%s506_s20] sm:$0xff]  ;;  %v281_v34 = vld [vmem:[%s506_s20 + $0x8] sm:$0xff]  ;;  %v282_v36 = vld [vmem:[%s506_s20 + $0x10] sm:$0xff] }
  0x33   : > { %v283_v40 = vld [vmem:[%s506_s20 + $0x18] sm:$0xff] }
  0x35   : > { %v276_v30 = vld [vmem:[#allocation2 + $0x10] sm:$0xff] }
  0x36   : > { %v277_v32 = vld [vmem:[#allocation2] sm:$0xff]  ;;  %v284_v33 = vmul.f32 %v280_v31, %v276_v30 }
  0x37   : > { %v278_v35 = vld [vmem:[#allocation2 + $0x18] sm:$0xff]  ;;  %v285_v37 = vmul.f32 %v281_v34, %v277_v32 }
  0x38   : > { %v286_v38 = vmul.f32 %v282_v36, %v278_v35  ;;  %v279_v39 = vld [vmem:[#allocation2 + $0x8] sm:$0xff]  ;;  %288 = vst [vmem:[%s511_s23] sm:$0xff] %v284_v33 }
  0x39   : > { %v287_v41 = vmul.f32 %v283_v40, %v279_v39  ;;  %289 = vst [vmem:[%s511_s23 + $0x8] sm:$0xff] %v285_v37 }
  0x3a   : > { %290 = vst [vmem:[%s511_s23 + $0x10] sm:$0xff] %v286_v38 }
  0x3b   : > { %291 = vst [vmem:[%s511_s23 + $0x18] sm:$0xff] %v287_v41 }
  0x3c PF: > { %s13_s14 = sadd.s32 1, %s463_s14   ;;  %s549_s12 = smov %s459_s13 }
  0x3d   : > { %p10_p6 = scmp.ge.s32.totalorder %s13_s14, 4   ;;  %s550_s13 = smov %s552_s15 }
  0x3f   :  { %12 = sbr.rel (!%p10_p6) target bundleno = 2 (0x2), region = 69 }

</bundles_post_ra>
